<compile_context>
chip_gen: v7x
topology: tpu7x:2x2x1
jax: 0.10.0
libtpu: 0.0.40
codegen_flags: <defaults>
</compile_context>

<pallas_src>
import jax
import jax.numpy as jnp
from jax.experimental import pallas as pl
from jax.experimental.pallas import tpu as pltpu


def _round_up(x: int, m: int) -> int:
    return ((x + m - 1) // m) * m


def _device_vmem_limit_bytes() -> int:
    """Generation-aware scoped-VMEM ceiling."""
    try:
        kind = jax.devices()[0].device_kind.lower()
    except Exception:  # pragma: no cover - defensive
        kind = ""
    if "v7" in kind:                                    # v7x: 64 MiB physical / TC
        return 48 * 1024 * 1024
    if "v5 lite" in kind or "v5e" in kind or "v6" in kind:
        return 100 * 1024 * 1024                        # v5e / v6e: 128 MiB physical
    return 48 * 1024 * 1024                             # conservative default


def embedding_mil_forward(x, w1, b1, w2, b2, *, tb=None, tn=None,
                          stream_dtype=jnp.bfloat16, vmem_limit_bytes=None):
    """EmbeddingMIL forward.

    x:  [B, N, E] float32 bag embeddings
    w1: [E, H], b1: [1, H]   (encoder Linear, weight transposed)
    w2: [H, C], b2: [1, C]   (classifier Linear, weight transposed), C == 1
    stream_dtype: dtype for the HBM->VMEM stream of x and w1 (default bf16 --
                  the kernel is HBM-bound); None keeps the exact f32 path.
    Returns bag predictions of shape [B].
    """
    B, N, E = x.shape
    H = w1.shape[1]
    C = w2.shape[1]
    if C != 1:
        # TODO(synk): generalize classifier head to num_classes > 1.
        raise NotImplementedError("kernel specializes num_classes=1 (module default)")

    # Optional low-precision streaming of the two big operands only.
    if stream_dtype is not None:
        x = x.astype(stream_dtype)
        w1 = w1.astype(stream_dtype)
    b1 = b1.reshape(1, H).astype(jnp.float32)            # (1, H), kept f32
    w2_row = jnp.transpose(w2).astype(jnp.float32)       # (1, H) lane-dense row
    b2 = b2.reshape(1).astype(jnp.float32)               # (1,) scalar -> SMEM

    itemsize = jnp.dtype(x.dtype).itemsize
    sub = 16 if itemsize == 2 else 8                     # sublane tile (bf16 packs 2/row)

    if vmem_limit_bytes is None:
        vmem_limit_bytes = _device_vmem_limit_bytes()

    # --- tile selection -------------------------------------------------------
    if tb is None:                                       # bags per step (lane width of out)
        tb = min(128, _round_up(B, 8))
        if B >= 16:
            # >= 2 bag blocks so v7x's two TensorCores both get work on axis 0.
            tb = min(tb, _round_up(-(-B // 2), 8))
    tb = max(8, _round_up(tb, 8))

    if tn is None:                                       # patch-chunk per reduction step
        # Full live-set budget: 2x x block (double buffer) + f32 h intermediate
        # + 2x W1 + acc/pooled scratch + headroom for small operands/out blocks.
        budget = int(0.70 * vmem_limit_bytes)
        fixed = 2 * E * H * itemsize + tb * H * 4 + 4 * H * 4 + 64 * 1024
        per_tn = tb * (2 * E * itemsize + 4 * H)
        cap = max(sub, (budget - fixed) // per_tn)
        tn = min(_round_up(N, sub), cap)
    tn = max(sub, (tn // sub) * sub)

    B_pad = _round_up(B, tb)
    N_pad = _round_up(N, tn)
    n_pad_rows = N_pad - N                               # zero-padded patch rows
    nb = B_pad // tb                                     # number of bag blocks

    if (B_pad, N_pad) != (B, N):
        x = jnp.pad(x, ((0, B_pad - B), (0, N_pad - N), (0, 0)))

    grid = (nb, N_pad // tn)                             # (bags: parallel, patches: reduce)
    inv_n = 1.0 / float(N)

    # --- kernel ---------------------------------------------------------------
    def kernel(x_ref, w1_ref, b1_ref, w2_ref, b2_ref, o_ref, acc_ref):
        k = pl.program_id(1)

        @pl.when(k == 0)
        def _init():
            acc_ref[...] = jnp.zeros_like(acc_ref)

        # Encoder: one MXU matmul over TB*TN rows (fills the MXU M dim).
        x2d = x_ref[...].reshape(tb * tn, E)             # merge leading dims (layout-free)
        h = jnp.dot(x2d, w1_ref[...], preferred_element_type=jnp.float32)
        h = jnp.maximum(h + b1_ref[...], 0.0)            # bias + ReLU in f32, (TB*TN, H)

        # Per-bag partial sum over this patch chunk (sublane reduction on XLU).
        acc_ref[...] += jnp.sum(h.reshape(tb, tn, H), axis=1)

        @pl.when(k == pl.num_programs(1) - 1)
        def _finalize():
            acc = acc_ref[...]                           # (TB, H) running sum
            if n_pad_rows:
                # Each zero-padded patch row contributed exactly relu(b1); remove it.
                acc = acc - jnp.float32(n_pad_rows) * jnp.maximum(b1_ref[...], 0.0)
            pooled = acc * jnp.float32(inv_n)            # mean over the *true* N

            # Classifier for the whole TB-bag block in one contraction:
            # (1, H) . (TB, H)^T -> (1, TB): bag index lands on the lane axis.
            logit = jax.lax.dot_general(
                w2_ref[...], pooled,
                dimension_numbers=(((1,), (1,)), ((), ())),
                preferred_element_type=jnp.float32)
            probs = jax.nn.sigmoid(logit + b2_ref[0])    # (1, TB)
            o_ref[...] = probs.reshape(1, 1, tb).astype(o_ref.dtype)   # lane-dense store

    out = pl.pallas_call(
        kernel,
        out_shape=jax.ShapeDtypeStruct((nb, 1, tb), jnp.float32),
        grid_spec=pltpu.PrefetchScalarGridSpec(
            num_scalar_prefetch=0,
            grid=grid,
            in_specs=[
                pl.BlockSpec((tb, tn, E), lambda b, k: (b, k, 0)),     # x chunk
                pl.BlockSpec((E, H), lambda b, k: (0, 0)),             # W1 (resident)
                pl.BlockSpec((1, H), lambda b, k: (0, 0)),             # b1
                pl.BlockSpec((1, H), lambda b, k: (0, 0)),             # w2 row
                pl.BlockSpec(memory_space=pltpu.MemorySpace.SMEM),     # b2 scalar
            ],
            out_specs=pl.BlockSpec((1, 1, tb), lambda b, k: (b, 0, 0)),  # lane-dense row
            scratch_shapes=[pltpu.VMEM((tb, H), jnp.float32)],         # running bag sums
        ),
        compiler_params=pltpu.CompilerParams(
            dimension_semantics=("parallel", "arbitrary"),
            vmem_limit_bytes=vmem_limit_bytes,
        ),
    )(x, w1, b1, w2_row, b2)

    # (nb, 1, tb) -> (B_pad,) -> drop padded bags; matches x.squeeze(1) -> [B].
    return out.reshape(B_pad)[:B]


def _reference_forward(x, w1, b1, w2, b2):
    h = jnp.maximum(jnp.einsum("bne,eh->bnh", x, w1) + b1.reshape(-1), 0.0)
    pooled = jnp.mean(h, axis=1)
    logit = pooled @ w2 + b2.reshape(-1)
    return jax.nn.sigmoid(logit).squeeze(1)


if __name__ == "__main__":
    key = jax.random.PRNGKey(0)

    # --- small shapes consistent with the module's forward ---------------------
    #   batch=2 bags, num_patches=8, embedding_size=32, fcl_encoder_dim=32, C=1
    B, N, E, H, C = 2, 8, 32, 32, 1
    kx, kw1, kb1, kw2, kb2, kx2, kw1b, kw2b = jax.random.split(key, 8)

    x = jax.random.normal(kx, (B, N, E), dtype=jnp.float32)
    w1 = jax.random.normal(kw1, (E, H), dtype=jnp.float32) * 0.1
    b1 = jax.random.normal(kb1, (1, H), dtype=jnp.float32) * 0.1
    w2 = jax.random.normal(kw2, (H, C), dtype=jnp.float32) * 0.1
    b2 = jax.random.normal(kb2, (1, C), dtype=jnp.float32) * 0.1

    # Exact f32 path (matches the PyTorch module bit-for-bit up to summation order).
    y = jax.block_until_ready(
        embedding_mil_forward(x, w1, b1, w2, b2, stream_dtype=None))
    y_ref = _reference_forward(x, w1, b1, w2, b2)
    assert y.shape == (B,), f"unexpected output shape {y.shape}"
    assert jnp.allclose(y, y_ref, atol=1e-5, rtol=1e-5), (y, y_ref)

    # Default bf16-streaming path (also exercises the N-padding correction since
    # the bf16 sublane tile rounds the patch chunk up to 16).
    y_bf16 = jax.block_until_ready(embedding_mil_forward(x, w1, b1, w2, b2))
    y_ref_bf16 = _reference_forward(
        x.astype(jnp.bfloat16).astype(jnp.float32),
        w1.astype(jnp.bfloat16).astype(jnp.float32), b1, w2, b2)
    assert y_bf16.shape == (B,)
    assert jnp.allclose(y_bf16, y_ref_bf16, atol=5e-4, rtol=5e-4), (y_bf16, y_ref_bf16)

    # Larger config: >= 2 bag blocks (v7x megacore path), multi-step patch
    # reduction, bag padding and patch padding, bf16 streaming.
    B2, N2, E2, H2 = 20, 300, 32, 64
    x2 = jax.random.normal(kx2, (B2, N2, E2), dtype=jnp.float32)
    w1b = jax.random.normal(kw1b, (E2, H2), dtype=jnp.float32) * 0.1
    b1b = jax.random.normal(kb1, (1, H2), dtype=jnp.float32) * 0.1
    w2b = jax.random.normal(kw2b, (H2, 1), dtype=jnp.float32) * 0.1
    b2b = jax.random.normal(kb2, (1, 1), dtype=jnp.float32) * 0.1

    y2 = jax.block_until_ready(
        embedding_mil_forward(x2, w1b, b1b, w2b, b2b, tn=64))
    y2_ref = _reference_forward(
        x2.astype(jnp.bfloat16).astype(jnp.float32),
        w1b.astype(jnp.bfloat16).astype(jnp.float32), b1b, w2b, b2b)
    assert y2.shape == (B2,), f"unexpected output shape {y2.shape}"
    assert jnp.allclose(y2, y2_ref, atol=5e-4, rtol=5e-4), (y2, y2_ref)

    print("KERNEL_OK")
</pallas_src>

<mosaic_0001>
module attributes {stable_mosaic.version = 11 : i64} {
  func.func @kernel(%arg0: i32, %arg1: i32, %arg2: memref<8x8x32xf32, #tpu.memory_space<vmem>>, %arg3: memref<32x32xf32, #tpu.memory_space<vmem>>, %arg4: memref<1x32xf32, #tpu.memory_space<vmem>>, %arg5: memref<1x32xf32, #tpu.memory_space<vmem>>, %arg6: memref<1xf32, #tpu.memory_space<smem>>, %arg7: memref<1x1x8xf32, #tpu.memory_space<vmem>>, %arg8: memref<8x32xf32, #tpu.memory_space<vmem>>) attributes {dimension_semantics = [#tpu.dimension_semantics<parallel>, #tpu.dimension_semantics<arbitrary>], iteration_bounds = array<i64: 1, 1>, scalar_prefetch = 0 : i64, scratch_operands = 1 : i64, tpu.core_type = #tpu.core_type<tc>, window_params = [{transform_indices = @transform_0, window_bounds = array<i64: 8, 8, 32>}, {pipeline_mode = #tpu.pipeline_mode<synchronous>, transform_indices = @transform_1, window_bounds = array<i64: 32, 32>}, {pipeline_mode = #tpu.pipeline_mode<synchronous>, transform_indices = @transform_2, window_bounds = array<i64: 1, 32>}, {pipeline_mode = #tpu.pipeline_mode<synchronous>, transform_indices = @transform_3, window_bounds = array<i64: 1, 32>}, {transform_indices = @transform_4, window_bounds = array<i64: 1>}, {transform_indices = @transform_5, window_bounds = array<i64: 1, 1, 8>}]} {
    %c0_i32 = arith.constant 0 : i32
    %0 = arith.cmpi eq, %arg1, %c0_i32 : i32
    %1 = arith.extui %0 : i1 to i32
    %c0_i32_0 = arith.constant 0 : i32
    %2 = arith.cmpi ne, %1, %c0_i32_0 : i32
    scf.if %2 {
      %cst_15 = arith.constant 0.000000e+00 : f32
      %20 = vector.broadcast %cst_15 : f32 to vector<8x32xf32>
      %c0_16 = arith.constant 0 : index
      %c0_17 = arith.constant 0 : index
      %21 = vector.load %arg8[%c0_16, %c0_17] : memref<8x32xf32, #tpu.memory_space<vmem>>, vector<8x32xf32>
      tpu.vector_store %arg8[%c0_16, %c0_17], %20 {strides = array<i32>} : memref<8x32xf32, #tpu.memory_space<vmem>>, vector<8x32xf32>,
    } else {
    }
    %c0 = arith.constant 0 : index
    %c0_1 = arith.constant 0 : index
    %c0_2 = arith.constant 0 : index
    %3 = vector.load %arg2[%c0, %c0_1, %c0_2] : memref<8x8x32xf32, #tpu.memory_space<vmem>>, vector<8x8x32xf32>
    %4 = vector.shape_cast %3 : vector<8x8x32xf32> to vector<64x32xf32>
    %c0_3 = arith.constant 0 : index
    %c0_4 = arith.constant 0 : index
    %5 = vector.load %arg3[%c0_3, %c0_4] : memref<32x32xf32, #tpu.memory_space<vmem>>, vector<32x32xf32>
    %cst = arith.constant dense<0.000000e+00> : vector<64x32xf32>
    %6 = tpu.matmul %4, %5, %cst {dimension_numbers = #tpu.dot_dimension_numbers<[1], [0], [0], [1], [0, 0, 1, 1], [], []>} : vector<64x32xf32>, vector<32x32xf32>, vector<64x32xf32> -> vector<64x32xf32>
    %c0_5 = arith.constant 0 : index
    %c0_6 = arith.constant 0 : index
    %7 = vector.load %arg4[%c0_5, %c0_6] : memref<1x32xf32, #tpu.memory_space<vmem>>, vector<1x32xf32>
    %8 = vector.broadcast %7 : vector<1x32xf32> to vector<64x32xf32>
    %9 = arith.addf %6, %8 : vector<64x32xf32>
    %cst_7 = arith.constant 0.000000e+00 : f32
    %10 = vector.broadcast %cst_7 : f32 to vector<64x32xf32>
    %11 = arith.maximumf %9, %10 : vector<64x32xf32>
    %c0_8 = arith.constant 0 : index
    %c0_9 = arith.constant 0 : index
    %12 = vector.load %arg8[%c0_8, %c0_9] : memref<8x32xf32, #tpu.memory_space<vmem>>, vector<8x32xf32>
    %13 = vector.shape_cast %11 : vector<64x32xf32> to vector<8x8x32xf32>
    %cst_10 = arith.constant dense<0.000000e+00> : vector<8x32xf32>
    %14 = vector.multi_reduction <add>, %13, %cst_10 [1] : vector<8x8x32xf32> to vector<8x32xf32>
    %15 = arith.addf %12, %14 : vector<8x32xf32>
    %c0_11 = arith.constant 0 : index
    %c0_12 = arith.constant 0 : index
    %16 = vector.load %arg8[%c0_11, %c0_12] : memref<8x32xf32, #tpu.memory_space<vmem>>, vector<8x32xf32>
    tpu.vector_store %arg8[%c0_11, %c0_12], %15 {strides = array<i32>} : memref<8x32xf32, #tpu.memory_space<vmem>>, vector<8x32xf32>,
    %c0_i32_13 = arith.constant 0 : i32
    %17 = arith.cmpi eq, %arg1, %c0_i32_13 : i32
    %18 = arith.extui %17 : i1 to i32
    %c0_i32_14 = arith.constant 0 : i32
    %19 = arith.cmpi ne, %18, %c0_i32_14 : i32
    scf.if %19 {
      %c0_15 = arith.constant 0 : index
      %c0_16 = arith.constant 0 : index
      %20 = vector.load %arg8[%c0_15, %c0_16] : memref<8x32xf32, #tpu.memory_space<vmem>>, vector<8x32xf32>
      %cst_17 = arith.constant 1.250000e-01 : f32
      %21 = vector.broadcast %cst_17 : f32 to vector<8x32xf32>
      %22 = arith.mulf %20, %21 : vector<8x32xf32>
      %c0_18 = arith.constant 0 : index
      %c0_19 = arith.constant 0 : index
      %23 = vector.load %arg5[%c0_18, %c0_19] : memref<1x32xf32, #tpu.memory_space<vmem>>, vector<1x32xf32>
      %cst_20 = arith.constant dense<0.000000e+00> : vector<1x8xf32>
      %24 = tpu.matmul %23, %22, %cst_20 {dimension_numbers = #tpu.dot_dimension_numbers<[1], [1], [0], [0], [0, 0, 1, 0], [], []>} : vector<1x32xf32>, vector<8x32xf32>, vector<1x8xf32> -> vector<1x8xf32>
      %c0_21 = arith.constant 0 : index
      %25 = memref.load %arg6[%c0_21] : memref<1xf32, #tpu.memory_space<smem>>
      %26 = vector.broadcast %25 : f32 to vector<1x8xf32>
      %27 = arith.addf %24, %26 : vector<1x8xf32>
      %28 = arith.negf %27 : vector<1x8xf32>
      %29 = math.exp %28 : vector<1x8xf32>
      %cst_22 = arith.constant 1.000000e+00 : f32
      %30 = vector.broadcast %cst_22 : f32 to vector<1x8xf32>
      %31 = arith.addf %30, %29 : vector<1x8xf32>
      %32 = arith.divf %30, %31 : vector<1x8xf32>
      %33 = vector.shape_cast %32 : vector<1x8xf32> to vector<1x1x8xf32>
      %c0_23 = arith.constant 0 : index
      %c0_24 = arith.constant 0 : index
      %c0_25 = arith.constant 0 : index
      %34 = vector.load %arg7[%c0_23, %c0_24, %c0_25] : memref<1x1x8xf32, #tpu.memory_space<vmem>>, vector<1x1x8xf32>
      tpu.vector_store %arg7[%c0_23, %c0_24, %c0_25], %33 {strides = array<i32>} : memref<1x1x8xf32, #tpu.memory_space<vmem>>, vector<1x1x8xf32>,
    } else {
    }
    return
  }
  func.func @transform_0(%arg0: i32, %arg1: i32) -> (i32, i32, i32) {
    %c0_i32 = arith.constant 0 : i32
    %c0_i32_0 = arith.constant 0 : i32
    return %arg0, %arg1, %c0_i32 : i32, i32, i32
  }
  func.func @transform_1(%arg0: i32, %arg1: i32) -> (i32, i32) {
    %c0_i32 = arith.constant 0 : i32
    %c0_i32_0 = arith.constant 0 : i32
    %c0_i32_1 = arith.constant 0 : i32
    return %c0_i32, %c0_i32_0 : i32, i32
  }
  func.func @transform_2(%arg0: i32, %arg1: i32) -> (i32, i32) {
    %c0_i32 = arith.constant 0 : i32
    %c0_i32_0 = arith.constant 0 : i32
    %c0_i32_1 = arith.constant 0 : i32
    return %c0_i32, %c0_i32_0 : i32, i32
  }
  func.func @transform_3(%arg0: i32, %arg1: i32) -> (i32, i32) {
    %c0_i32 = arith.constant 0 : i32
    %c0_i32_0 = arith.constant 0 : i32
    %c0_i32_1 = arith.constant 0 : i32
    return %c0_i32, %c0_i32_0 : i32, i32
  }
  func.func @transform_4(%arg0: i32, %arg1: i32) -> i32 {
    %c0_i32 = arith.constant 0 : i32
    %c0_i32_0 = arith.constant 0 : i32
    return %c0_i32 : i32
  }
  func.func @transform_5(%arg0: i32, %arg1: i32) -> (i32, i32, i32) {
    %c0_i32 = arith.constant 0 : i32
    %c0_i32_0 = arith.constant 0 : i32
    %c0_i32_1 = arith.constant 0 : i32
    return %arg0, %c0_i32, %c0_i32_0 : i32, i32, i32
  }
}

</mosaic_0001>

<bundles_post_ra>
// kernel: tpu_custom_call.1
= control target key start
LH: loop header
LB: loop body
LE: loop exit
PB: predicated region body
PF: predicated region fallthrough
CT: control target
= control target key end

     0   :  { %11 = vsyncpa [#allocation5], 0  ;;  %s651_s0 = inlined_call_operand.hbm [shape: f32[8,8,32], index: 0, kind: input, shape index: {}]   ;;  %s652_s1 = inlined_call_operand.hbm [shape: f32[32,32], index: 1, kind: input, shape index: {}]   ;;  %s653_s2 = inlined_call_operand.vmem [shape: f32[1,32], index: 2, kind: input, shape index: {}]   ;;  %s654_s3 = inlined_call_operand.vmem [shape: f32[1,32], index: 3, kind: input, shape index: {}]   ;;  %s655_s4 = inlined_call_operand.<no memory space> [shape: f32[1], index: 4, kind: input, shape index: {}]   ;;  %s656_s5 = inlined_call_operand.hbm [shape: f32[1,1,8], index: 5, kind: output, shape index: {}]  }
   0x1   :  { %12 = vsyncpa [#allocation8], 0 }
   0x2   :  { %13 = vsyncpa [#allocation6], 0  ;;  %s549_s18 = smov [#allocation4]   ;;  %s477_s22 = scalar_lea.hbm %s651_s0, 1024 }
   0x3   :  { %s19_s19 = sshll.u32 %s549_s18, 4  ;;  %p478_p0 = scmp.ne.s32.totalorder %s651_s0, %s477_s22  ;;  %s20_s19 = int_to_ptr.vmem [resolvable:$true] %s19_s19 }
   0x4   :  { %p481_p1 = scmp.lt.u32.totalorder %s477_s22, %s651_s0 }
   0x6   :  { %p483_p2 = pnand %p481_p1, %p478_p0 }
   0x8   :  { %486 = shalt.err (!%p483_p2)
}
   0x9   :  { %s487_s27 = scalar_lea.vmem %s20_s19, 1024  ;;  %p492_p4 = scmp.lt.s32.totalorder %s20_s19, %s20_s19 }
   0xa   :  { %p488_p3 = scmp.ne.s32.totalorder %s20_s19, %s487_s27  ;;  %p493_p5 = scmp.lt.s32.totalorder %s487_s27, %s487_s27 }
   0xc   :  { %p494_p6 = por %p493_p5, %p492_p4 }
   0xe   :  { %p495_p7 = pnand %p494_p6, %p488_p3 }
  0x10   :  { %498 = shalt.err (!%p495_p7)
}
  0x11   :  { %s550_s28 = smov 128   ;;  %s551_s29 = smov 8  }
  0x12   :  { %25 = dma.hbm_to_vmem [thread:$0]  %s651_s0, 1024, %s20_s19, [#allocation5], %s550_s28, %s550_s28, %s551_s29  }
  0x13   :  { %s552_s7 = smov [#allocation7]   ;;  %s499_s11 = scalar_lea.hbm %s652_s1, 512 }
  0x14   :  { %s31_s8 = sshll.u32 %s552_s7, 4  ;;  %p500_p8 = scmp.ne.s32.totalorder %s652_s1, %s499_s11  ;;  %s32_s8 = int_to_ptr.vmem [resolvable:$true] %s31_s8 }
  0x15   :  { %p503_p9 = scmp.lt.u32.totalorder %s499_s11, %s652_s1 }
  0x17   :  { %p505_p10 = pnand %p503_p9, %p500_p8 }
  0x19   :  { %508 = shalt.err (!%p505_p10)
}
  0x1a   :  { %s509_s16 = scalar_lea.vmem %s32_s8, 512  ;;  %p514_p12 = scmp.lt.s32.totalorder %s32_s8, %s32_s8 }
  0x1b   :  { %p510_p11 = scmp.ne.s32.totalorder %s32_s8, %s509_s16  ;;  %p515_p13 = scmp.lt.s32.totalorder %s509_s16, %s509_s16 }
  0x1d   :  { %p516_p0 = por %p515_p13, %p514_p12 }
  0x1f   :  { %p517_p1 = pnand %p516_p0, %p510_p11 }
  0x21   :  { %520 = shalt.err (!%p517_p1)
}
  0x22   :  { %37 = dma.hbm_to_vmem [thread:$0]  %s652_s1, 512, %s32_s8, [#allocation8], %s550_s28, %s550_s28, %s551_s29  }
  0x23   :  { %543 = dma.done.wait [#allocation5], 1024  }
  0x24   :  { %544 = vsyncadd [#allocation5], 4294966272 }
  0x25   :  { %545 = dma.done.wait [#allocation8], 512  }
  0x26   :  { %546 = vsyncadd [#allocation8], 4294966784  ;;  %vm54_vm0 = vcmask 261120   ;;  %v64_v0 = vld [vmem:[#allocation7] sm:$0xff]  ;;  %v65_v1 = vld [vmem:[#allocation7 + $0x8] sm:$0xff]  ;;  %v553_v14 = vmov 0.0  }
  0x27   :  { %v66_v2 = vld [vmem:[#allocation7 + $0x10] sm:$0xff]  ;;  %v454_v3 = vpack.c.bf16 %v65_v1, %v64_v0  ;;  %v67_v4 = vld [vmem:[#allocation7 + $0x18] sm:$0xff]  ;;  %v56_v5 = vld [vmem:[#allocation4] sm:$0xff]  ;;  %55 = vst.msk [vmem:[#allocation2] sm:$0xff] %vm54_vm0, %v553_v14  ;;  %vm554_vm1 = vmmov 0   ;;  %vm278_vm2 = vcmask 1041409  }
  0x28   :  { %v458_v6 = vpack.c.bf16 %v67_v4, %v66_v2  ;;  %437 = vmatprep.mubr.msk.f32.mxu0 %vm54_vm0, %v56_v5  ;;  %v62_v7 = vld [vmem:[#allocation4 + $0x30] sm:$0xff]  ;;  %v57_v8 = vld [vmem:[#allocation4 + $0x8] sm:$0xff]  ;;  %v63_v9 = vld [vmem:[#allocation4 + $0x38] sm:$0xff]  ;;  %vm280_vm3 = vcmask 1042434   ;;  %vm282_vm4 = vcmask 1043459   ;;  %vm284_vm5 = vcmask 1044484  }
  0x29   :  { %455 = vmatprep.subr.bf16.mxu0 %v454_v3  ;;  %462 = vmatprep.subr.bf16.mxu1 %v454_v3  ;;  %v58_v10 = vld [vmem:[#allocation4 + $0x10] sm:$0xff]  ;;  %v59_v11 = vld [vmem:[#allocation4 + $0x18] sm:$0xff]  ;;  %v60_v12 = vld [vmem:[#allocation4 + $0x20] sm:$0xff]  ;;  %vm286_vm6 = vcmask 1045509   ;;  %vm288_vm7 = vcmask 1046534   ;;  %vm290_vm8 = vcmask 1047559  }
  0x2a   :  { %457 = vmatpush3.bf16.msra.mxu0 %v454_v3  ;;  %464 = vmatpush3.bf16.msra.mxu1 %v454_v3  ;;  %v61_v13 = vld [vmem:[#allocation4 + $0x28] sm:$0xff]  ;;  %v403_v15 = vld [vmem:[%s653_s2] ss:$0 sm:$0xff]  ;;  %s555_s22 = smov [#allocation9]   ;;  %vm385_vm9 = vcmask 57344  }
  0x2b   :  { %459 = vmatprep.subr.bf16.mxu0 %v458_v6  ;;  %463 = vmatprep.subr.bf16.mxu1 %v458_v6  ;;  %s393_s23 = sshll.u32 %s555_s22, 4  ;;  %s394_s23 = int_to_ptr.vmem [resolvable:$true] %s393_s23 }
  0x2c   :  { %446 = vmatprep.mubr.msk.f32.mxu1 %vm54_vm0, %v62_v7  ;;  %s525_s24 = scalar_lea.vmem %s394_s23, 32  ;;  %p526_p3 = scmp.lt.s32.totalorder %s394_s23, %s394_s23 }
  0x2e   :  { %461 = vmatpush3.bf16.msra.mxu0 %v458_v6  ;;  %465 = vmatpush3.bf16.msra.mxu1 %v458_v6 }
  0x2f   :  { %449 = vmatprep.subr.mxu1 %v553_v14 }
  0x31   :  { %438 = vmatmul.mubr.msk.f32.vlgmr.msra.gmra.mrb[0].mxu0 %vm54_vm0, %v57_v8  ;;  %447 = vmatmul.mubr.msk.f32.vlgmr.msra.gmra.mrb[0].mxu1 %vm54_vm0, %v63_v9 }
  0x32   :  { %440 = vmatprep.mubr.msk.f32.mxu0 %vm54_vm0, %v58_v10  ;;  %451 = vmatprep.mubr.msk.f32.mxu1 %vm554_vm1, %v553_v14 }
  0x35   :  { %441 = vmatmul.mubr.msk.f32.gmra.mrb[2].mxu0 %vm54_vm0, %v59_v11 }
  0x36   :  { %443 = vmatprep.mubr.msk.f32.mxu0 %vm54_vm0, %v60_v12 }
  0x39   :  { %444 = vmatmul.mubr.msk.f32.gmra.mrb[4].mxu0 %vm54_vm0, %v61_v13 }
 0x104   :  { %v439_v16 = vpop.f32.mrb[0].mxu0  ;;  %v448_v17 = vpop.f32.mrb[0].mxu1 }
 0x105   :  { %v172_v18 = vadd.f32 %v439_v16, %v403_v15  ;;  %v166_v19 = vpop.f32.mrb[1].mxu0  ;;  %v202_v20 = vadd.f32 %v448_v17, %v403_v15  ;;  %v196_v21 = vpop.f32.mrb[1].mxu1 }
 0x106   :  { %v167_v22 = vadd.f32 %v403_v15, %v166_v19  ;;  %v197_v23 = vadd.f32 %v403_v15, %v196_v21 }
 0x107   :  { %v206_v24 = vmax.f32 %v172_v18, 0.0  ;;  %v212_v25 = vmax.f32 %v202_v20, 0.0 }
 0x108   :  { %v205_v26 = vmax.f32 %v167_v22, 0.0  ;;  %v442_v27 = vpop.f32.mrb[2].mxu0  ;;  %v211_v28 = vmax.f32 %v197_v23, 0.0 }
 0x109   :  { %v221_v29 = vsel %vm54_vm0, %v206_v24, 0.0  ;;  %v182_v30 = vadd.f32 %v442_v27, %v403_v15  ;;  %v176_v31 = vpop.f32.mrb[3].mxu0  ;;  %v263_v36 = vsel %vm54_vm0, %v212_v25, 0.0 }
 0x10a   :  { %v222_v32 = vrot.slane %v221_v29, 4  ;;  %v214_v33 = vsel %vm54_vm0, %v205_v26, 0.0  ;;  %v256_v34 = vsel %vm54_vm0, %v211_v28, 0.0  ;;  %v177_v38 = vadd.f32 %v403_v15, %v176_v31 }
 0x10b   :  { %v215_v35 = vrot.slane %v214_v33, 4  ;;  %v208_v37 = vmax.f32 %v182_v30, 0.0  ;;  %v257_v43 = vrot.slane %v256_v34, 4  ;;  %v264_v47 = vrot.slane %v263_v36, 4 }
 0x10c   :  { %v223_v39 = vadd.f32 %v222_v32, %v221_v29  ;;  %v445_v40 = vpop.f32.mrb[4].mxu0  ;;  %v207_v44 = vmax.f32 %v177_v38, 0.0 }
 0x10d   :  { %v216_v41 = vadd.f32 %v215_v35, %v214_v33  ;;  %v235_v42 = vsel %vm54_vm0, %v208_v37, 0.0  ;;  %v186_v45 = vpop.f32.mrb[5].mxu0  ;;  %v192_v49 = vadd.f32 %v445_v40, %v403_v15  ;;  %v258_v57 = vadd.f32 %v257_v43, %v256_v34  ;;  %v213_v37 = vld [vmem:[#allocation2] sm:$0xff] }
 0x10e   :  { %v224_v46 = vrot.slane %v223_v39, 2  ;;  %v236_v48 = vrot.slane %v235_v42, 4  ;;  %v228_v51 = vsel %vm54_vm0, %v207_v44, 0.0  ;;  %v187_v52 = vadd.f32 %v403_v15, %v186_v45  ;;  %v300_v43 = vld [vmem:[%s654_s3] sm:$0x1]  ;;  %s521_s3 = scalar_lea.vmem %s394_s23, 16 }
 0x10f   :  { %v217_v50 = vrot.slane %v216_v41, 2  ;;  %v229_v55 = vrot.slane %v228_v51, 4  ;;  %v210_v58 = vmax.f32 %v192_v49, 0.0  ;;  %v265_v61 = vadd.f32 %v264_v47, %v263_v36  ;;  %p522_p2 = scmp.ne.s32.totalorder %s394_s23, %s521_s3  ;;  %p527_p4 = scmp.lt.s32.totalorder %s525_s24, %s521_s3 }
 0x110   :  { %v225_v53 = vadd.f32 %v224_v46, %v223_v39  ;;  %v237_v54 = vadd.f32 %v236_v48, %v235_v42  ;;  %v209_v59 = vmax.f32 %v187_v52, 0.0  ;;  %v259_v7 = vrot.slane %v258_v57, 2 }
 0x111   :  { %v218_v56 = vadd.f32 %v217_v50, %v216_v41  ;;  %v230_v63 = vadd.f32 %v229_v55, %v228_v51  ;;  %v249_v1 = vsel %vm54_vm0, %v210_v58, 0.0  ;;  %v266_v10 = vrot.slane %v265_v61, 2  ;;  %p528_p5 = por %p527_p4, %p526_p3 }
 0x112   :  { %v226_v60 = vrot.slane %v225_v53, 1  ;;  %v238_v62 = vrot.slane %v237_v54, 2  ;;  %v242_v2 = vsel %vm54_vm0, %v209_v59, 0.0  ;;  %v250_v8 = vrot.slane %v249_v1, 4 }
 0x113   :  { %v219_v0 = vrot.slane %v218_v56, 1  ;;  %v231_v5 = vrot.slane %v230_v63, 2  ;;  %v243_v9 = vrot.slane %v242_v2, 4  ;;  %v260_v17 = vadd.f32 %v259_v7, %v258_v57  ;;  %p529_p6 = pnand %p528_p5, %p522_p2 }
 0x114   :  { %v227_v3 = vadd.f32 %v226_v60, %v225_v53  ;;  %v239_v4 = vadd.f32 %v238_v62, %v237_v54  ;;  %v251_v14 = vadd.f32 %v250_v8, %v249_v1  ;;  %v267_v20 = vadd.f32 %v266_v10, %v265_v61 }
 0x115   :  { %v220_v6 = vadd.f32 %v219_v0, %v218_v56  ;;  %v232_v11 = vadd.f32 %v231_v5, %v230_v63  ;;  %v244_v15 = vadd.f32 %v243_v9, %v242_v2  ;;  %v261_v26 = vrot.slane %v260_v17, 1 }
 0x116   :  { %v240_v13 = vrot.slane %v239_v4, 1  ;;  %v252_v18 = vrot.slane %v251_v14, 2  ;;  %v268_v30 = vrot.slane %v267_v20, 1  ;;  %v302_v44 = vstv %s655_s4 }
 0x117   :  { %v279_v12 = vsel %vm278_vm2, %v227_v3, %v220_v6  ;;  %v233_v16 = vrot.slane %v232_v11, 1  ;;  %v245_v19 = vrot.slane %v244_v15, 2  ;;  %v262_v33 = vadd.f32 %v261_v26, %v260_v17 }
 0x118   :  { %v241_v22 = vadd.f32 %v240_v13, %v239_v4  ;;  %v253_v23 = vadd.f32 %v252_v18, %v251_v14  ;;  %v269_v35 = vadd.f32 %v268_v30, %v267_v20 }
 0x119   :  { %v234_v21 = vadd.f32 %v233_v16, %v232_v11  ;;  %v246_v24 = vadd.f32 %v245_v19, %v244_v15 }
 0x11a   :  { %v254_v27 = vrot.slane %v253_v23, 1 }
 0x11b   :  { %v281_v25 = vsel %vm280_vm3, %v234_v21, %v279_v12  ;;  %v247_v28 = vrot.slane %v246_v24, 1 }
 0x11c   :  { %v283_v29 = vsel %vm282_vm4, %v241_v22, %v281_v25  ;;  %v255_v32 = vadd.f32 %v254_v27, %v253_v23 }
 0x11d   :  { %v248_v31 = vadd.f32 %v247_v28, %v246_v24 }
 0x11f   :  { %v285_v34 = vsel %vm284_vm5, %v248_v31, %v283_v29 }
 0x120   :  { %v287_v36 = vsel %vm286_vm6, %v255_v32, %v285_v34 }
 0x121   :  { %v289_v38 = vsel %vm288_vm7, %v262_v33, %v287_v36 }
 0x122   :  { %v291_v39 = vsel %vm290_vm8, %v269_v35, %v289_v38 }
 0x123   :  { %v293_v40 = vadd.f32 %v291_v39, %v213_v37 }
 0x125   :  { %294 = vst.msk [vmem:[#allocation2] sm:$0xff] %vm54_vm0, %v293_v40 }
 0x12c   :  { %v298_v41 = vld [vmem:[#allocation2] sm:$0xff] }
 0x12d   :  { %v299_v42 = vmul.f32 0.125, %v298_v41 }
 0x12f   :  { %450 = vmatpush3.xpose.msk.msra.mxu1 %vm54_vm0, %v299_v42 }
 0x132   :  { %452 = vmatmul.mubr.msk.f32.vlgmr.msra.gmra.mrb[2].mxu1 %vm54_vm0, %v300_v43 }
 0x205   :  { %v375_v45 = vpop.f32.mrb[2].mxu1 }
 0x206   :  { %v376_v46 = vadd.f32 %v375_v45, %v302_v44  ;;  %v453_v47 = vpop.f32.mrb[3].mxu1 }
 0x208   :  { %v414_v48 = vmul.f32 -1.442695, %v376_v46 }
 0x20a   :  { %473 = vpow2.f32 %v414_v48 }
 0x214   :  { %v474_v49 = vpop.eup %473 }
 0x215   :  { %v382_v50 = vadd.f32 1.0, %v474_v49 }
 0x217   :  { %475 = vrcp.f32 %v382_v50 }
 0x221   :  { %v476_v51 = vpop.eup %475 }
 0x222   :  { %386 = vst.msk [vmem:[#allocation9] sm:$0x1] %vm385_vm9, %v476_v51 }
 0x223   :  { %532 = shalt.err (!%p529_p6)
}
 0x224   :  { %s533_s26 = scalar_lea.hbm %s656_s5, 16 }
 0x225   :  { %p534_p7 = scmp.ne.s32.totalorder %s656_s5, %s533_s26  ;;  %p537_p8 = scmp.lt.u32.totalorder %s533_s26, %s656_s5 }
 0x227   :  { %p539_p9 = pnand %p537_p8, %p534_p7 }
 0x229   :  { %542 = shalt.err (!%p539_p9)
}
 0x22a   :  { %396 = dma.vmem_to_hbm [thread:$0]  %s394_s23, 16, %s656_s5, [#allocation6]  }
 0x22b   :  { %547 = dma.done.wait [#allocation6], 16  }
 0x22c   :  { %548 = vsyncadd [#allocation6], 4294967280 }
 0x22d   :  { %400 = vsyncpa [#allocation5], 1 }
 0x22e   :  { %401 = vsyncpa [#allocation8], 1 }
 0x22f   :  { %402 = vsyncpa [#allocation6], 1 }

</bundles_post_ra>
